<compile_context>
chip_gen: v5e
topology: v5e:2x2
jax: 0.10.0
libtpu: 0.0.40
codegen_flags: <defaults>
</compile_context>

<pallas_src>
import functools

import jax
import jax.numpy as jnp
from jax import lax
from jax.experimental import pallas as pl
from jax.experimental.pallas import tpu as pltpu


def _round_up(x, m):
    return ((x + m - 1) // m) * m


@functools.lru_cache(maxsize=None)
def _vmem_limit_bytes():
    """~75% of physical VMEM: ~48 MiB on v7x, ~96 MiB on v5e/v6e."""
    cap = 64 * 1024 * 1024
    try:
        info = pltpu.get_tpu_info()
        cap = int(getattr(info, "vmem_capacity_bytes", cap) or cap)
    except Exception:
        pass
    return min((cap * 3) // 4, 100 * 1024 * 1024)


# ---------------- prefill path: dense  x @ W^T  (as x @ W_t) ----------------

def _dense_kernel(x_ref, wt_ref, o_ref, acc_ref):
    @pl.when(pl.program_id(2) == 0)
    def _init():
        acc_ref[...] = jnp.zeros_like(acc_ref)

    acc_ref[...] += jnp.dot(x_ref[...], wt_ref[...],
                            preferred_element_type=jnp.float32)

    @pl.when(pl.program_id(2) == pl.num_programs(2) - 1)
    def _store():
        o_ref[...] = acc_ref[...].astype(o_ref.dtype)


def _dense_tiles(M, Kp, Np, vmem_limit):
    tk = 512 if Kp % 512 == 0 else Kp            # Kp padded to 512-multiple at init
    tn = next(t for t in (1024, 512, 256, 128) if Np % t == 0)
    if M >= 1024 and M % 1024 == 0:
        tm = 1024
    elif M > 512:
        tm = 512
    else:
        tm = _round_up(M, 16)                    # single M block (== full padded dim)

    def footprint(tm_, tn_, tk_):
        return (2 * tm_ * tk_ * 2                # x tiles  (bf16, double-buffered)
                + 2 * tk_ * tn_ * 2              # w tiles  (bf16, double-buffered)
                + 2 * tm_ * tn_ * 2              # out tiles (bf16, double-buffered)
                + tm_ * tn_ * 4)                 # f32 accumulator scratch

    while footprint(tm, tn, tk) > (vmem_limit * 3) // 4 and tn > 128:
        tn //= 2
    while footprint(tm, tn, tk) > (vmem_limit * 3) // 4 and tm > 128:
        tm //= 2
    return tm, tn, tk


def dense_matmul(x2d, w_t, n_out):
    """x2d: (M, K) bf16;  w_t: (Kp, Np) bf16 pre-transposed/padded weight."""
    M, K = x2d.shape
    Kp, Np = w_t.shape
    assert Kp >= K and Np % 128 == 0 and Kp % 128 == 0

    vmem_limit = _vmem_limit_bytes()
    tm, tn, tk = _dense_tiles(M, Kp, Np, vmem_limit)
    Mp = _round_up(M, tm)

    x_p = x2d
    if Mp != M or Kp != K:
        x_p = jnp.pad(x2d, ((0, Mp - M), (0, Kp - K)))

    grid = (Mp // tm, Np // tn, Kp // tk)
    cost = pl.CostEstimate(
        flops=2 * Mp * Np * Kp,
        transcendentals=0,
        bytes_accessed=(Mp * Kp + Kp * Np + Mp * Np) * 2,
    )

    out = pl.pallas_call(
        _dense_kernel,
        out_shape=jax.ShapeDtypeStruct((Mp, Np), jnp.bfloat16),   # bf16 writeback
        grid_spec=pltpu.PrefetchScalarGridSpec(
            num_scalar_prefetch=0,
            grid=grid,
            in_specs=[pl.BlockSpec((tm, tk), lambda i, j, k: (i, k)),
                      pl.BlockSpec((tk, tn), lambda i, j, k: (k, j))],
            out_specs=pl.BlockSpec((tm, tn), lambda i, j, k: (i, j)),
            scratch_shapes=[pltpu.VMEM((tm, tn), jnp.float32)],
        ),
        compiler_params=pltpu.CompilerParams(
            dimension_semantics=("parallel", "parallel", "arbitrary"),
            vmem_limit_bytes=vmem_limit,
        ),
        cost_estimate=cost,
    )(x_p, w_t)
    return out[:M, :n_out]


# ------------- decode path: HBM row gather (activated neurons) + GEMV -------------

def _gated_kernel(ids_ref, x_ref, w_hbm, o_ref, fw_ref, sem,
                  *, r_chunk, num_chunks):
    # ids_ref: SMEM (R_pad,) int32 activated-neuron indices (scalar prefetch)
    # x_ref:   VMEM (Mp, Kp) bf16 activations (resident block)
    # w_hbm:   HBM  (Np, Kp) bf16 full weight -- only activated rows are DMA'd
    # fw_ref:  VMEM (2, r_chunk, Kp) double-buffered gathered rows (filtered_W chunk)

    def issue(chunk_base, slot):
        # Launch all r_chunk row DMAs of one chunk before any wait so the DMA
        # engines stay ahead of compute; unrolled so descriptor issue (SMEM
        # index read + address calc + start) packs on the scalar/misc slots.
        def body(r, carry):
            src = ids_ref[chunk_base + r]
            pltpu.make_async_copy(
                w_hbm.at[pl.ds(src, 1), :],
                fw_ref.at[slot, pl.ds(r, 1), :],
                sem.at[slot],
            ).start()
            return carry
        lax.fori_loop(0, r_chunk, body, 0, unroll=8)

    issue(0, 0)  # prime the pipeline with chunk 0

    @pl.loop(0, num_chunks)
    def _(c):
        slot = c % 2

        # Prefetch next chunk's rows into the other buffer before waiting.
        @pl.when(c + 1 < num_chunks)
        def _prefetch():
            issue((c + 1) * r_chunk, 1 - slot)

        # Single wait per chunk: the descriptor covers (r_chunk, Kp), whose
        # byte count equals the r_chunk single-row copies issued above.
        pltpu.make_async_copy(
            w_hbm.at[pl.ds(0, r_chunk), :],
            fw_ref.at[slot],
            sem.at[slot],
        ).wait()

        # x @ filtered_W_chunk^T (same contraction layout as flash-attn q@k^T,
        # which lowers without an explicit XLU transpose in the loop).
        fw = fw_ref[slot]                                  # (r_chunk, Kp)
        off = pl.multiple_of(c * r_chunk, r_chunk)         # lane-aligned store
        o_ref[:, pl.ds(off, r_chunk)] = lax.dot_general(
            x_ref[...], fw,
            (((1,), (1,)), ((), ())),
            preferred_element_type=jnp.float32,
        ).astype(o_ref.dtype)


def gated_matmul(x2d, w_rows, act_ids, *, r_chunk_max=512):
    """x2d: (M, K) bf16; w_rows: (Np, Kp) bf16 weight (stays in HBM);
    act_ids: (remained,) int32 activated neuron indices."""
    M, K = x2d.shape
    Np, Kp = w_rows.shape
    remained = act_ids.shape[0]

    vmem_limit = _vmem_limit_bytes()
    Mp = _round_up(M, 8)                               # sublane-aligned M
    # Keep the double-buffered gather scratch (2 * r_chunk * Kp * 2B) <= ~1/3 VMEM.
    rows_by_vmem = max(128, ((vmem_limit // 3) // (4 * Kp)) // 128 * 128)
    r_chunk = min(r_chunk_max, rows_by_vmem, _round_up(remained, 128))
    R_pad = _round_up(remained, r_chunk)               # lane-dense output width
    num_chunks = R_pad // r_chunk

    x_p = jnp.pad(x2d, ((0, Mp - M), (0, Kp - K)))
    # Padded tail ids are 0 (tail chunk redundantly re-fetches row 0; correct
    # after slicing, small bandwidth waste).
    ids_p = jnp.pad(act_ids.astype(jnp.int32), (0, R_pad - remained))

    kernel = functools.partial(_gated_kernel, r_chunk=r_chunk,
                               num_chunks=num_chunks)
    cost = pl.CostEstimate(
        flops=2 * Mp * R_pad * Kp,
        transcendentals=0,
        bytes_accessed=(Mp * Kp + R_pad * Kp) * 2 + Mp * R_pad * 4,
    )

    out = pl.pallas_call(
        kernel,
        out_shape=jax.ShapeDtypeStruct((Mp, R_pad), jnp.float32),
        grid_spec=pltpu.PrefetchScalarGridSpec(
            num_scalar_prefetch=1,                     # act_ids -> SMEM
            grid=(1,),
            in_specs=[pl.BlockSpec((Mp, Kp), lambda g, ids: (0, 0)),
                      pl.BlockSpec(memory_space=pl.ANY)],     # weight stays in HBM
            out_specs=pl.BlockSpec((Mp, R_pad), lambda g, ids: (0, 0)),
            scratch_shapes=[
                pltpu.VMEM((2, r_chunk, Kp), w_rows.dtype),   # double-buffered gather
                pltpu.SemaphoreType.DMA((2,)),
            ],
        ),
        compiler_params=pltpu.CompilerParams(
            dimension_semantics=("arbitrary",),
            vmem_limit_bytes=vmem_limit,
        ),
        cost_estimate=cost,
    )(ids_p, x_p, w_rows)
    return out[:M, :remained]


# ---------------- module-level wrapper ----------------

class GateLayerPallas:
    """Pallas port of GateLayer.

    weight:   (hidden_out, hidden_in) float32 (stored padded as bf16)
    act_list: (num_clusters, >=remained_neurons) int32 per-cluster activated
              neuron indices (models `act_list[:][:remained_neurons]`)
    """

    def __init__(self, weight, act_list, sparsity):
        N, K = weight.shape
        self.hidden_out = N
        self.hidden_in = K
        self.remained_neurons = int(N * sparsity)
        self.act_list = jnp.asarray(act_list)[:, : self.remained_neurons].astype(jnp.int32)

        Np = _round_up(N, 128)
        Kp = _round_up(K, 512)                 # K padded to 512 so dense tk=512 always
        w_pad = jnp.pad(jnp.asarray(weight), ((0, Np - N), (0, Kp - K))).astype(jnp.bfloat16)
        self.w_rows = w_pad                    # (Np, Kp): decode gather source (HBM)
        self._w_t = None                       # (Kp, Np): built lazily on first prefill

    def _dense_weight(self):
        # TODO(synk): `memory_limit` host offload has no kernel equivalent; the
        # pre-transposed copy is just materialized lazily so decode-only
        # deployments (e.g. 16 GiB v5e) never pay the doubled weight footprint.
        if self._w_t is None:
            self._w_t = jnp.asarray(jnp.transpose(self.w_rows))
        return self._w_t

    def forward(self, x, cluster_num=0):       # cluster_num plays the role of global_cluster
        B, S, K = x.shape
        x2d = x.reshape(B * S, K).astype(jnp.bfloat16)
        if S > 1:
            out = dense_matmul(x2d, self._dense_weight(), self.hidden_out)
            return out.reshape(B, S, self.hidden_out)
        else:
            act_ids = self.act_list[cluster_num]
            out = gated_matmul(x2d, self.w_rows, act_ids)
            return out.reshape(B, S, self.remained_neurons)


if __name__ == "__main__":
    key = jax.random.PRNGKey(0)
    k1, k2, k3, k4 = jax.random.split(key, 4)

    batch, seq, hidden_in, hidden_out = 2, 8, 128, 256
    sparsity = 0.5
    num_clusters = 4
    remained = int(hidden_out * sparsity)

    # deterministic synthetic parameters
    weight = jax.random.normal(k1, (hidden_out, hidden_in), jnp.float32) * 0.02
    act_list = jnp.stack([
        jax.random.permutation(jax.random.fold_in(k2, c), hidden_out)[:remained]
        for c in range(num_clusters)
    ]).astype(jnp.int32)

    layer = GateLayerPallas(weight, act_list, sparsity)
    w_bf = weight.astype(jnp.bfloat16)

    # --- prefill branch (x.size(1) > 1): out = x @ W^T ---
    x_prefill = jax.random.normal(k3, (batch, seq, hidden_in), jnp.float32)
    y_prefill = jax.block_until_ready(layer.forward(x_prefill))
    ref_prefill = jnp.dot(
        x_prefill.reshape(-1, hidden_in).astype(jnp.bfloat16), w_bf.T,
        preferred_element_type=jnp.float32).reshape(batch, seq, hidden_out)
    assert y_prefill.shape == (batch, seq, hidden_out)
    assert jnp.allclose(y_prefill.astype(jnp.float32), ref_prefill,
                        atol=2e-2, rtol=2e-2)

    # --- decode branch (x.size(1) == 1): out = x @ filtered_W^T ---
    cluster_num = 1
    x_decode = jax.random.normal(k4, (batch, 1, hidden_in), jnp.float32)
    y_decode = jax.block_until_ready(layer.forward(x_decode, cluster_num))
    filtered_W_bf = w_bf[act_list[cluster_num]]
    ref_decode = jnp.dot(
        x_decode.reshape(-1, hidden_in).astype(jnp.bfloat16), filtered_W_bf.T,
        preferred_element_type=jnp.float32).reshape(batch, 1, remained)
    assert y_decode.shape == (batch, 1, remained)
    assert jnp.allclose(y_decode, ref_decode, atol=2e-3, rtol=2e-3)

    print("KERNEL_OK")
</pallas_src>

<mosaic_0001>
module attributes {stable_mosaic.version = 11 : i64} {
  func.func @_dense_kernel(%arg0: i32, %arg1: i32, %arg2: i32, %arg3: memref<16x512xbf16, #tpu.memory_space<vmem>>, %arg4: memref<512x256xbf16, #tpu.memory_space<vmem>>, %arg5: memref<16x256xbf16, #tpu.memory_space<vmem>>, %arg6: memref<16x256xf32, #tpu.memory_space<vmem>>) attributes {dimension_semantics = [#tpu.dimension_semantics<parallel>, #tpu.dimension_semantics<parallel>, #tpu.dimension_semantics<arbitrary>], iteration_bounds = array<i64: 1, 1, 1>, scalar_prefetch = 0 : i64, scratch_operands = 1 : i64, tpu.core_type = #tpu.core_type<tc>, window_params = [{transform_indices = @transform_0, window_bounds = array<i64: 16, 512>}, {transform_indices = @transform_1, window_bounds = array<i64: 512, 256>}, {transform_indices = @transform_2, window_bounds = array<i64: 16, 256>}]} {
    %c0_i32 = arith.constant 0 : i32
    %0 = arith.cmpi eq, %arg2, %c0_i32 : i32
    %1 = arith.extui %0 : i1 to i32
    %c0_i32_0 = arith.constant 0 : i32
    %2 = arith.cmpi ne, %1, %c0_i32_0 : i32
    scf.if %2 {
      %cst_10 = arith.constant 0.000000e+00 : f32
      %12 = vector.broadcast %cst_10 : f32 to vector<16x256xf32>
      %c0_11 = arith.constant 0 : index
      %c0_12 = arith.constant 0 : index
      %13 = vector.load %arg6[%c0_11, %c0_12] : memref<16x256xf32, #tpu.memory_space<vmem>>, vector<16x256xf32>
      tpu.vector_store %arg6[%c0_11, %c0_12], %12 {strides = array<i32>} : memref<16x256xf32, #tpu.memory_space<vmem>>, vector<16x256xf32>,
    } else {
    }
    %c0 = arith.constant 0 : index
    %c0_1 = arith.constant 0 : index
    %3 = vector.load %arg6[%c0, %c0_1] : memref<16x256xf32, #tpu.memory_space<vmem>>, vector<16x256xf32>
    %c0_2 = arith.constant 0 : index
    %c0_3 = arith.constant 0 : index
    %4 = vector.load %arg3[%c0_2, %c0_3] : memref<16x512xbf16, #tpu.memory_space<vmem>>, vector<16x512xbf16>
    %c0_4 = arith.constant 0 : index
    %c0_5 = arith.constant 0 : index
    %5 = vector.load %arg4[%c0_4, %c0_5] : memref<512x256xbf16, #tpu.memory_space<vmem>>, vector<512x256xbf16>
    %cst = arith.constant dense<0.000000e+00> : vector<16x256xf32>
    %6 = tpu.matmul %4, %5, %cst {dimension_numbers = #tpu.dot_dimension_numbers<[1], [0], [0], [1], [0, 0, 1, 1], [], []>} : vector<16x512xbf16>, vector<512x256xbf16>, vector<16x256xf32> -> vector<16x256xf32>
    %7 = arith.addf %3, %6 : vector<16x256xf32>
    %c0_6 = arith.constant 0 : index
    %c0_7 = arith.constant 0 : index
    %8 = vector.load %arg6[%c0_6, %c0_7] : memref<16x256xf32, #tpu.memory_space<vmem>>, vector<16x256xf32>
    tpu.vector_store %arg6[%c0_6, %c0_7], %7 {strides = array<i32>} : memref<16x256xf32, #tpu.memory_space<vmem>>, vector<16x256xf32>,
    %c0_i32_8 = arith.constant 0 : i32
    %9 = arith.cmpi eq, %arg2, %c0_i32_8 : i32
    %10 = arith.extui %9 : i1 to i32
    %c0_i32_9 = arith.constant 0 : i32
    %11 = arith.cmpi ne, %10, %c0_i32_9 : i32
    scf.if %11 {
      %c0_10 = arith.constant 0 : index
      %c0_11 = arith.constant 0 : index
      %12 = vector.load %arg6[%c0_10, %c0_11] : memref<16x256xf32, #tpu.memory_space<vmem>>, vector<16x256xf32>
      %13 = arith.truncf %12 : vector<16x256xf32> to vector<16x256xbf16>
      %c0_12 = arith.constant 0 : index
      %c0_13 = arith.constant 0 : index
      %14 = vector.load %arg5[%c0_12, %c0_13] : memref<16x256xbf16, #tpu.memory_space<vmem>>, vector<16x256xbf16>
      tpu.vector_store %arg5[%c0_12, %c0_13], %13 {strides = array<i32>} : memref<16x256xbf16, #tpu.memory_space<vmem>>, vector<16x256xbf16>,
    } else {
    }
    return
  }
  func.func @transform_0(%arg0: i32, %arg1: i32, %arg2: i32) -> (i32, i32) {
    %c0_i32 = arith.constant 0 : i32
    return %arg0, %arg2 : i32, i32
  }
  func.func @transform_1(%arg0: i32, %arg1: i32, %arg2: i32) -> (i32, i32) {
    %c0_i32 = arith.constant 0 : i32
    return %arg2, %arg1 : i32, i32
  }
  func.func @transform_2(%arg0: i32, %arg1: i32, %arg2: i32) -> (i32, i32) {
    %c0_i32 = arith.constant 0 : i32
    return %arg0, %arg1 : i32, i32
  }
}

</mosaic_0001>

<bundles_post_ra>
// kernel: tpu_custom_call.1
= control target key start
LH: loop header
LB: loop body
LE: loop exit
PB: predicated region body
PF: predicated region fallthrough
CT: control target
= control target key end

     0   :  { %7 = vsyncpa [#allocation4], 0  ;;  %s1093_s0 = inlined_call_operand.hbm [shape: bf16[16,512], index: 0, kind: input, shape index: {}]   ;;  %s1094_s1 = inlined_call_operand.hbm [shape: bf16[512,256], index: 1, kind: input, shape index: {}]   ;;  %s1095_s2 = inlined_call_operand.hbm [shape: bf16[16,256], index: 2, kind: output, shape index: {}]  }
   0x1   :  { %8 = vsyncpa [#allocation7], 0 }
   0x2   :  { %9 = vsyncpa [#allocation5], 0  ;;  %s14_s11 = sshll.u32 %s1093_s0, 4  ;;  %s1040_s12 = smov [#allocation3]   ;;  %s15_s11 = int_to_ptr.hbm [resolvable:$true] %s14_s11 }
   0x3   :  { %s16_s13 = sshll.u32 %s1040_s12, 4  ;;  %s27_s16 = sshll.u32 %s1094_s1, 4  ;;  %s17_s13 = int_to_ptr.vmem [resolvable:$true] %s16_s13  ;;  %s28_s16 = int_to_ptr.hbm [resolvable:$true] %s27_s16 }
   0x4   :  { %s1041_s17 = smov 256   ;;  %s1042_s18 = smov 16  }
   0x5   :  { %22 = dma.hbm_to_vmem [thread:$0]  %s15_s11, 512, %s17_s13, [#allocation4], %s1041_s17, %s1041_s17, %s1042_s18  }
   0x6   :  { %s1043_s19 = smov [#allocation6]   ;;  %s1044_s21 = smov 128  }
   0x7   :  { %s29_s20 = sshll.u32 %s1043_s19, 4  ;;  %s1045_s22 = smov 8   ;;  %s30_s20 = int_to_ptr.vmem [resolvable:$true] %s29_s20 }
   0x8   :  { %35 = dma.hbm_to_vmem [thread:$0]  %s28_s16, 8192, %s30_s20, [#allocation7], %s1044_s21, %s1044_s21, %s1045_s22  }
   0x9   :  { %1034 = dma.done.wait [#allocation4], 512  }
   0xa   :  { %1035 = vsyncadd [#allocation4], 4294966784 }
   0xb   :  { %1036 = dma.done.wait [#allocation7], 8192  }
   0xc   :  { %1037 = vsyncadd [#allocation7], 4294959104  ;;  %v689_v0 = vld [vmem:[#allocation6 + $0x70] sm:$0xf]  ;;  %v906_v1 = vld [vmem:[#allocation6 + $0x74] sm:$0xf0] }
   0xd   :  { %v753_v2 = vld [vmem:[#allocation6 + $0xf0] sm:$0xf]  ;;  %v690_v3 = vor.u32 %v906_v1, %v689_v0  ;;  %v922_v4 = vld [vmem:[#allocation6 + $0xf4] sm:$0xf0]  ;;  %v681_v11 = vld [vmem:[#allocation6 + $0x60] sm:$0xf] }
   0xe   :  { %v817_v5 = vld [vmem:[#allocation6 + $0x170] sm:$0xf]  ;;  %v938_v6 = vld [vmem:[#allocation6 + $0x174] sm:$0xf0]  ;;  %v754_v7 = vor.u32 %v922_v4, %v753_v2  ;;  %v904_v13 = vld [vmem:[#allocation6 + $0x64] sm:$0xf0] }
   0xf   :  { %v818_v8 = vor.u32 %v938_v6, %v817_v5  ;;  %v881_v9 = vld [vmem:[#allocation6 + $0x1f0] sm:$0xf]  ;;  %v954_v10 = vld [vmem:[#allocation6 + $0x1f4] sm:$0xf0]  ;;  %464 = vmatpush.bf16.msra.mxu0 %v690_v3  ;;  %v745_v14 = vld [vmem:[#allocation6 + $0xe0] sm:$0xf]  ;;  %v682_v16 = vor.u32 %v904_v13, %v681_v11 }
  0x10   :  { %v882_v12 = vor.u32 %v954_v10, %v881_v9  ;;  %v920_v15 = vld [vmem:[#allocation6 + $0xe4] sm:$0xf0]  ;;  %478 = vmatpush.bf16.msra.mxu1 %v754_v7  ;;  %v809_v18 = vld [vmem:[#allocation6 + $0x160] sm:$0xf]  ;;  %v673_v23 = vld [vmem:[#allocation6 + $0x50] sm:$0xf] }
  0x11   :  { %492 = vmatpush.bf16.msra.mxu2 %v818_v8  ;;  %v746_v17 = vor.u32 %v920_v15, %v745_v14  ;;  %v936_v19 = vld [vmem:[#allocation6 + $0x164] sm:$0xf0]  ;;  %v873_v20 = vld [vmem:[#allocation6 + $0x1e0] sm:$0xf]  ;;  %v902_v24 = vld [vmem:[#allocation6 + $0x54] sm:$0xf0] }
  0x12   :  { %506 = vmatpush.bf16.msra.mxu3 %v882_v12  ;;  %v810_v21 = vor.u32 %v936_v19, %v809_v18  ;;  %v952_v22 = vld [vmem:[#allocation6 + $0x1e4] sm:$0xf0]  ;;  %v737_v26 = vld [vmem:[#allocation6 + $0xd0] sm:$0xf]  ;;  %v918_v27 = vld [vmem:[#allocation6 + $0xd4] sm:$0xf0]  ;;  %v674_v29 = vor.u32 %v902_v24, %v673_v23 }
  0x13   :  { %v874_v25 = vor.u32 %v952_v22, %v873_v20  ;;  %v801_v28 = vld [vmem:[#allocation6 + $0x150] sm:$0xf]  ;;  %465 = vmatpush.bf16.msra.mxu0 %v682_v16  ;;  %v934_v30 = vld [vmem:[#allocation6 + $0x154] sm:$0xf0]  ;;  %v738_v33 = vor.u32 %v918_v27, %v737_v26  ;;  %v665_v35 = vld [vmem:[#allocation6 + $0x40] sm:$0xf] }
  0x14   :  { %v865_v31 = vld [vmem:[#allocation6 + $0x1d0] sm:$0xf]  ;;  %v950_v32 = vld [vmem:[#allocation6 + $0x1d4] sm:$0xf0]  ;;  %479 = vmatpush.bf16.msra.mxu1 %v746_v17  ;;  %v802_v34 = vor.u32 %v934_v30, %v801_v28  ;;  %v900_v36 = vld [vmem:[#allocation6 + $0x44] sm:$0xf0] }
  0x15   :  { %493 = vmatpush.bf16.msra.mxu2 %v810_v21  ;;  %v729_v37 = vld [vmem:[#allocation6 + $0xc0] sm:$0xf]  ;;  %v866_v38 = vor.u32 %v950_v32, %v865_v31  ;;  %v916_v39 = vld [vmem:[#allocation6 + $0xc4] sm:$0xf0]  ;;  %v666_v44 = vor.u32 %v900_v36, %v665_v35  ;;  %v657_v47 = vld [vmem:[#allocation6 + $0x30] sm:$0xf] }
  0x16   :  { %507 = vmatpush.bf16.msra.mxu3 %v874_v25  ;;  %v793_v40 = vld [vmem:[#allocation6 + $0x140] sm:$0xf]  ;;  %v932_v41 = vld [vmem:[#allocation6 + $0x144] sm:$0xf0]  ;;  %v730_v45 = vor.u32 %v916_v39, %v729_v37  ;;  %v898_v48 = vld [vmem:[#allocation6 + $0x34] sm:$0xf0] }
  0x17   :  { %v857_v42 = vld [vmem:[#allocation6 + $0x1c0] sm:$0xf]  ;;  %v948_v43 = vld [vmem:[#allocation6 + $0x1c4] sm:$0xf0]  ;;  %466 = vmatpush.bf16.msra.mxu0 %v674_v29  ;;  %v794_v46 = vor.u32 %v932_v41, %v793_v40  ;;  %v721_v49 = vld [vmem:[#allocation6 + $0xb0] sm:$0xf]  ;;  %v658_v56 = vor.u32 %v898_v48, %v657_v47 }
  0x18   :  { %480 = vmatpush.bf16.msra.mxu1 %v738_v33  ;;  %v858_v50 = vor.u32 %v948_v43, %v857_v42  ;;  %v914_v51 = vld [vmem:[#allocation6 + $0xb4] sm:$0xf0]  ;;  %v785_v52 = vld [vmem:[#allocation6 + $0x130] sm:$0xf]  ;;  %v649_v59 = vld [vmem:[#allocation6 + $0x20] sm:$0xf] }
  0x19   :  { %494 = vmatpush.bf16.msra.mxu2 %v802_v34  ;;  %v930_v53 = vld [vmem:[#allocation6 + $0x134] sm:$0xf0]  ;;  %v849_v54 = vld [vmem:[#allocation6 + $0x1b0] sm:$0xf]  ;;  %v722_v57 = vor.u32 %v914_v51, %v721_v49  ;;  %v896_v60 = vld [vmem:[#allocation6 + $0x24] sm:$0xf0] }
  0x1a   :  { %508 = vmatpush.bf16.msra.mxu3 %v866_v38  ;;  %v946_v55 = vld [vmem:[#allocation6 + $0x1b4] sm:$0xf0]  ;;  %v786_v58 = vor.u32 %v930_v53, %v785_v52  ;;  %v713_v61 = vld [vmem:[#allocation6 + $0xa0] sm:$0xf]  ;;  %v912_v63 = vld [vmem:[#allocation6 + $0xa4] sm:$0xf0]  ;;  %v650_v4 = vor.u32 %v896_v60, %v649_v59 }
  0x1b   :  { %467 = vmatpush.bf16.msra.mxu0 %v666_v44  ;;  %v850_v62 = vor.u32 %v946_v55, %v849_v54  ;;  %v777_v0 = vld [vmem:[#allocation6 + $0x120] sm:$0xf]  ;;  %v928_v1 = vld [vmem:[#allocation6 + $0x124] sm:$0xf0]  ;;  %v714_v5 = vor.u32 %v912_v63, %v713_v61  ;;  %v641_v7 = vld [vmem:[#allocation6 + $0x10] sm:$0xf] }
  0x1c   :  { %481 = vmatpush.bf16.msra.mxu1 %v730_v45  ;;  %v841_v2 = vld [vmem:[#allocation6 + $0x1a0] sm:$0xf]  ;;  %v944_v3 = vld [vmem:[#allocation6 + $0x1a4] sm:$0xf0]  ;;  %v778_v6 = vor.u32 %v928_v1, %v777_v0  ;;  %v894_v8 = vld [vmem:[#allocation6 + $0x14] sm:$0xf0] }
  0x1d   :  { %495 = vmatpush.bf16.msra.mxu2 %v794_v46  ;;  %v705_v9 = vld [vmem:[#allocation6 + $0x90] sm:$0xf]  ;;  %v842_v10 = vor.u32 %v944_v3, %v841_v2  ;;  %v910_v11 = vld [vmem:[#allocation6 + $0x94] sm:$0xf0]  ;;  %v633_v16 = vld [vmem:[#allocation6] sm:$0xf]  ;;  %v642_v17 = vor.u32 %v894_v8, %v641_v7 }
  0x1e   :  { %509 = vmatpush.bf16.msra.mxu3 %v858_v50  ;;  %v769_v12 = vld [vmem:[#allocation6 + $0x110] sm:$0xf]  ;;  %v926_v13 = vld [vmem:[#allocation6 + $0x114] sm:$0xf0]  ;;  %v892_v18 = vld [vmem:[#allocation6 + $0x4] sm:$0xf0]  ;;  %v706_v21 = vor.u32 %v910_v11, %v705_v9 }
  0x1f   :  { %468 = vmatpush.bf16.msra.mxu0 %v658_v56  ;;  %v833_v14 = vld [vmem:[#allocation6 + $0x190] sm:$0xf]  ;;  %v942_v15 = vld [vmem:[#allocation6 + $0x194] sm:$0xf0]  ;;  %v697_v19 = vld [vmem:[#allocation6 + $0x80] sm:$0xf]  ;;  %v770_v22 = vor.u32 %v926_v13, %v769_v12  ;;  %v634_v33 = vor.u32 %v892_v18, %v633_v16 }
  0x20   :  { %482 = vmatpush.bf16.msra.mxu1 %v722_v57  ;;  %v908_v20 = vld [vmem:[#allocation6 + $0x84] sm:$0xf0]  ;;  %v761_v23 = vld [vmem:[#allocation6 + $0x100] sm:$0xf]  ;;  %v834_v26 = vor.u32 %v942_v15, %v833_v14  ;;  %v905_v28 = vld [vmem:[#allocation6 + $0x74] sm:$0xf] }
  0x21   :  { %496 = vmatpush.bf16.msra.mxu2 %v786_v58  ;;  %v924_v24 = vld [vmem:[#allocation6 + $0x104] sm:$0xf0]  ;;  %v825_v25 = vld [vmem:[#allocation6 + $0x180] sm:$0xf]  ;;  %v691_v29 = vld [vmem:[#allocation6 + $0x78] sm:$0xf0]  ;;  %v698_v37 = vor.u32 %v908_v20, %v697_v19 }
  0x22   :  { %510 = vmatpush.bf16.msra.mxu3 %v850_v62  ;;  %v940_v27 = vld [vmem:[#allocation6 + $0x184] sm:$0xf0]  ;;  %v921_v30 = vld [vmem:[#allocation6 + $0xf4] sm:$0xf]  ;;  %v755_v31 = vld [vmem:[#allocation6 + $0xf8] sm:$0xf0]  ;;  %v762_v38 = vor.u32 %v924_v24, %v761_v23  ;;  %v694_v44 = vor.u32 %v905_v28, %v691_v29 }
  0x23   :  { %469 = vmatpush.bf16.msra.mxu0 %v650_v4  ;;  %v937_v32 = vld [vmem:[#allocation6 + $0x174] sm:$0xf]  ;;  %v819_v34 = vld [vmem:[#allocation6 + $0x178] sm:$0xf0]  ;;  %v903_v39 = vld [vmem:[#allocation6 + $0x64] sm:$0xf]  ;;  %v826_v43 = vor.u32 %v940_v27, %v825_v25  ;;  %v758_v49 = vor.u32 %v921_v30, %v755_v31 }
  0x24   :  { %483 = vmatpush.bf16.msra.mxu1 %v714_v5  ;;  %v953_v35 = vld [vmem:[#allocation6 + $0x1f4] sm:$0xf]  ;;  %v883_v36 = vld [vmem:[#allocation6 + $0x1f8] sm:$0xf0]  ;;  %v683_v40 = vld [vmem:[#allocation6 + $0x68] sm:$0xf0]  ;;  %v822_v50 = vor.u32 %v937_v32, %v819_v34 }
  0x25   :  { %497 = vmatpush.bf16.msra.mxu2 %v778_v6  ;;  %v625_v41 = vld [vmem:[#allocation3 + $0x8] sm:$0xf]  ;;  %v890_v42 = vld [vmem:[#allocation3 + $0x14] sm:$0xf0]  ;;  %v919_v45 = vld [vmem:[#allocation6 + $0xe4] sm:$0xf]  ;;  %v886_v54 = vor.u32 %v953_v35, %v883_v36  ;;  %v686_v63 = vor.u32 %v903_v39, %v683_v40 }
  0x26   :  { %511 = vmatpush.bf16.msra.mxu3 %v842_v10  ;;  %v747_v46 = vld [vmem:[#allocation6 + $0xe8] sm:$0xf0]  ;;  %v935_v47 = vld [vmem:[#allocation6 + $0x164] sm:$0xf]  ;;  %v627_v52 = vld [vmem:[#allocation3 + $0x18] sm:$0xf0]  ;;  %v1071_v55 = vor.u32 %v890_v42, %v625_v41 }
  0x27   :  { %470 = vmatpush.bf16.msra.mxu0 %v642_v17  ;;  %v811_v48 = vld [vmem:[#allocation6 + $0x168] sm:$0xf0]  ;;  %v617_v53 = vld [vmem:[#allocation3] sm:$0xf]  ;;  %v889_v56 = vld [vmem:[#allocation3 + $0xc] sm:$0xf0]  ;;  %v750_v1 = vor.u32 %v919_v45, %v747_v46 }
  0x28   :  { %484 = vmatpush.bf16.msra.mxu1 %v706_v21  ;;  %v888_v51 = vld [vmem:[#allocation3 + $0xc] sm:$0xf]  ;;  %v887_v57 = vld [vmem:[#allocation3 + $0x4] sm:$0xf]  ;;  %v619_v58 = vld [vmem:[#allocation3 + $0x10] sm:$0xf0]  ;;  %v1075_v62 = vor.u32 %v889_v56, %v617_v53  ;;  %v814_v2 = vor.u32 %v935_v47, %v811_v48 }
  0x29   :  { %498 = vmatpush.bf16.msra.mxu2 %v770_v22  ;;  %v951_v59 = vld [vmem:[#allocation6 + $0x1e4] sm:$0xf]  ;;  %v875_v60 = vld [vmem:[#allocation6 + $0x1e8] sm:$0xf0]  ;;  %v1073_v61 = vor.u32 %v888_v51, %v627_v52  ;;  %v1077_v0 = vor.u32 %v887_v57, %v619_v58  ;;  %v901_v3 = vld [vmem:[#allocation6 + $0x54] sm:$0xf] }
  0x2a   :  { %512 = vmatpush.bf16.msra.mxu3 %v834_v26  ;;  %v675_v4 = vld [vmem:[#allocation6 + $0x58] sm:$0xf0]  ;;  %v917_v5 = vld [vmem:[#allocation6 + $0xd4] sm:$0xf]  ;;  %v878_v6 = vor.u32 %v951_v59, %v875_v60  ;;  %v899_v15 = vld [vmem:[#allocation6 + $0x44] sm:$0xf] }
  0x2b   :  { %471 = vmatpush.bf16.msra.mxu0 %v634_v33  ;;  %v739_v7 = vld [vmem:[#allocation6 + $0xd8] sm:$0xf0]  ;;  %v933_v8 = vld [vmem:[#allocation6 + $0x154] sm:$0xf]  ;;  %v678_v12 = vor.u32 %v901_v3, %v675_v4  ;;  %v667_v16 = vld [vmem:[#allocation6 + $0x48] sm:$0xf0] }
  0x2c   :  { %485 = vmatpush.bf16.msra.mxu1 %v698_v37  ;;  %v803_v9 = vld [vmem:[#allocation6 + $0x158] sm:$0xf0]  ;;  %v949_v10 = vld [vmem:[#allocation6 + $0x1d4] sm:$0xf]  ;;  %v742_v13 = vor.u32 %v917_v5, %v739_v7  ;;  %v915_v17 = vld [vmem:[#allocation6 + $0xc4] sm:$0xf]  ;;  %v670_v24 = vor.u32 %v899_v15, %v667_v16 }
  0x2d   :  { %499 = vmatpush.bf16.msra.mxu2 %v762_v38  ;;  %v867_v11 = vld [vmem:[#allocation6 + $0x1d8] sm:$0xf0]  ;;  %v806_v14 = vor.u32 %v933_v8, %v803_v9  ;;  %v731_v19 = vld [vmem:[#allocation6 + $0xc8] sm:$0xf0]  ;;  %v931_v20 = vld [vmem:[#allocation6 + $0x144] sm:$0xf] }
  0x2e   :  { %513 = vmatpush.bf16.msra.mxu3 %v826_v43  ;;  %472 = vmatmul.bf16.vlgmr.msra.gmra.mxu0 %v1075_v62  ;;  %v870_v18 = vor.u32 %v949_v10, %v867_v11  ;;  %v795_v21 = vld [vmem:[#allocation6 + $0x148] sm:$0xf0]  ;;  %v947_v22 = vld [vmem:[#allocation6 + $0x1c4] sm:$0xf]  ;;  %v734_v25 = vor.u32 %v915_v17, %v731_v19  ;;  %v897_v27 = vld [vmem:[#allocation6 + $0x34] sm:$0xf] }
  0x2f   :  { %520 = vmatpush.bf16.msrb.mxu0 %v694_v44  ;;  %486 = vmatmul.bf16.vlgmr.msra.gmra.mxu1 %v1077_v0  ;;  %v859_v23 = vld [vmem:[#allocation6 + $0x1c8] sm:$0xf0]  ;;  %v798_v26 = vor.u32 %v931_v20, %v795_v21  ;;  %v659_v28 = vld [vmem:[#allocation6 + $0x38] sm:$0xf0]  ;;  %v913_v29 = vld [vmem:[#allocation6 + $0xb4] sm:$0xf] }
  0x30   :  { %534 = vmatpush.bf16.msrb.mxu1 %v758_v49  ;;  %500 = vmatmul.bf16.vlgmr.msra.gmra.mxu2 %v1071_v55  ;;  %v862_v30 = vor.u32 %v947_v22, %v859_v23  ;;  %v723_v31 = vld [vmem:[#allocation6 + $0xb8] sm:$0xf0]  ;;  %v929_v32 = vld [vmem:[#allocation6 + $0x134] sm:$0xf]  ;;  %v662_v36 = vor.u32 %v897_v27, %v659_v28  ;;  %v895_v39 = vld [vmem:[#allocation6 + $0x24] sm:$0xf] }
  0x31   :  { %548 = vmatpush.bf16.msrb.mxu2 %v822_v50  ;;  %514 = vmatmul.bf16.vlgmr.msra.gmra.mxu3 %v1073_v61  ;;  %v787_v33 = vld [vmem:[#allocation6 + $0x138] sm:$0xf0]  ;;  %v945_v34 = vld [vmem:[#allocation6 + $0x1b4] sm:$0xf]  ;;  %v726_v37 = vor.u32 %v913_v29, %v723_v31  ;;  %v651_v40 = vld [vmem:[#allocation6 + $0x28] sm:$0xf0] }
  0x32   :  { %562 = vmatpush.bf16.msrb.mxu3 %v886_v54  ;;  %v851_v35 = vld [vmem:[#allocation6 + $0x1b8] sm:$0xf0]  ;;  %v790_v38 = vor.u32 %v929_v32, %v787_v33  ;;  %v911_v41 = vld [vmem:[#allocation6 + $0xa4] sm:$0xf]  ;;  %v715_v43 = vld [vmem:[#allocation6 + $0xa8] sm:$0xf0]  ;;  %v654_v48 = vor.u32 %v895_v39, %v651_v40 }
  0x33   :  { %521 = vmatpush.bf16.msrb.mxu0 %v686_v63  ;;  %v854_v42 = vor.u32 %v945_v34, %v851_v35  ;;  %v927_v44 = vld [vmem:[#allocation6 + $0x124] sm:$0xf]  ;;  %v779_v45 = vld [vmem:[#allocation6 + $0x128] sm:$0xf0]  ;;  %v718_v49 = vor.u32 %v911_v41, %v715_v43  ;;  %v893_v51 = vld [vmem:[#allocation6 + $0x14] sm:$0xf] }
  0x34   :  { %535 = vmatpush.bf16.msrb.mxu1 %v750_v1  ;;  %v943_v46 = vld [vmem:[#allocation6 + $0x1a4] sm:$0xf]  ;;  %v843_v47 = vld [vmem:[#allocation6 + $0x1a8] sm:$0xf0]  ;;  %v782_v50 = vor.u32 %v927_v44, %v779_v45  ;;  %v643_v52 = vld [vmem:[#allocation6 + $0x18] sm:$0xf0] }
  0x35   :  { %549 = vmatpush.bf16.msrb.mxu2 %v814_v2  ;;  %v909_v53 = vld [vmem:[#allocation6 + $0x94] sm:$0xf]  ;;  %v846_v54 = vor.u32 %v943_v46, %v843_v47  ;;  %v707_v56 = vld [vmem:[#allocation6 + $0x98] sm:$0xf0]  ;;  %v646_v63 = vor.u32 %v893_v51, %v643_v52  ;;  %v891_v3 = vld [vmem:[#allocation6 + $0x4] sm:$0xf] }
  0x36   :  { %563 = vmatpush.bf16.msrb.mxu3 %v878_v6  ;;  %v925_v57 = vld [vmem:[#allocation6 + $0x114] sm:$0xf]  ;;  %v771_v58 = vld [vmem:[#allocation6 + $0x118] sm:$0xf0]  ;;  %v710_v1 = vor.u32 %v909_v53, %v707_v56  ;;  %v635_v4 = vld [vmem:[#allocation6 + $0x8] sm:$0xf0] }
  0x37   :  { %522 = vmatpush.bf16.msrb.mxu0 %v678_v12  ;;  %v941_v59 = vld [vmem:[#allocation6 + $0x194] sm:$0xf]  ;;  %v835_v60 = vld [vmem:[#allocation6 + $0x198] sm:$0xf0]  ;;  %v774_v2 = vor.u32 %v925_v57, %v771_v58  ;;  %v907_v5 = vld [vmem:[#allocation6 + $0x84] sm:$0xf]  ;;  %v638_v12 = vor.u32 %v891_v3, %v635_v4 }
  0x38   :  { %536 = vmatpush.bf16.msrb.mxu1 %v742_v13  ;;  %v838_v6 = vor.u32 %v941_v59, %v835_v60  ;;  %v699_v7 = vld [vmem:[#allocation6 + $0x88] sm:$0xf0]  ;;  %v923_v8 = vld [vmem:[#allocation6 + $0x104] sm:$0xf]  ;;  %s1046_s0 = smov [#allocation8]   ;;  %s601_s25 = sshll.u32 %s1095_s2, 4  ;;  %s602_s25 = int_to_ptr.hbm [resolvable:$true] %s601_s25 }
  0x39   :  { %550 = vmatpush.bf16.msrb.mxu2 %v806_v14  ;;  %v763_v9 = vld [vmem:[#allocation6 + $0x108] sm:$0xf0]  ;;  %v939_v10 = vld [vmem:[#allocation6 + $0x184] sm:$0xf]  ;;  %v702_v13 = vor.u32 %v907_v5, %v699_v7  ;;  %s599_s1 = sshll.u32 %s1046_s0, 4  ;;  %s600_s1 = int_to_ptr.vmem [resolvable:$true] %s599_s1 }
  0x3a   :  { %564 = vmatpush.bf16.msrb.mxu3 %v870_v18  ;;  %v827_v11 = vld [vmem:[#allocation6 + $0x188] sm:$0xf0]  ;;  %v766_v14 = vor.u32 %v923_v8, %v763_v9 }
  0x3b   :  { %523 = vmatpush.bf16.msrb.mxu0 %v670_v24  ;;  %v830_v15 = vor.u32 %v939_v10, %v827_v11 }
  0x3c   :  { %537 = vmatpush.bf16.msrb.mxu1 %v734_v25 }
  0x3d   :  { %551 = vmatpush.bf16.msrb.mxu2 %v798_v26 }
  0x3e   :  { %565 = vmatpush.bf16.msrb.mxu3 %v862_v30 }
  0x3f   :  { %524 = vmatpush.bf16.msrb.mxu0 %v662_v36 }
  0x40   :  { %538 = vmatpush.bf16.msrb.mxu1 %v726_v37 }
  0x41   :  { %552 = vmatpush.bf16.msrb.mxu2 %v790_v38 }
  0x42   :  { %566 = vmatpush.bf16.msrb.mxu3 %v854_v42 }
  0x43   :  { %525 = vmatpush.bf16.msrb.mxu0 %v654_v48 }
  0x44   :  { %539 = vmatpush.bf16.msrb.mxu1 %v718_v49 }
  0x45   :  { %553 = vmatpush.bf16.msrb.mxu2 %v782_v50 }
  0x46   :  { %567 = vmatpush.bf16.msrb.mxu3 %v846_v54 }
  0x47   :  { %526 = vmatpush.bf16.msrb.mxu0 %v646_v63 }
  0x48   :  { %540 = vmatpush.bf16.msrb.mxu1 %v710_v1 }
  0x49   :  { %554 = vmatpush.bf16.msrb.mxu2 %v774_v2 }
  0x4a   :  { %568 = vmatpush.bf16.msrb.mxu3 %v838_v6 }
  0x4b   :  { %527 = vmatpush.bf16.msrb.mxu0 %v638_v12 }
  0x4c   :  { %541 = vmatpush.bf16.msrb.mxu1 %v702_v13 }
  0x4d   :  { %555 = vmatpush.bf16.msrb.mxu2 %v766_v14 }
  0x4e   :  { %569 = vmatpush.bf16.msrb.mxu3 %v830_v15  ;;  %528 = vmatmul.bf16.vlgmr.msrb.gmra.mxu0 %v1075_v62 }
  0x4f   :  { %542 = vmatmul.bf16.vlgmr.msrb.gmra.mxu1 %v1077_v0 }
  0x50   :  { %556 = vmatmul.bf16.vlgmr.msrb.gmra.mxu2 %v1071_v55 }
  0x51   :  { %570 = vmatmul.bf16.vlgmr.msrb.gmra.mxu3 %v1073_v61 }
  0xab   :  { %v473_v16 = vpop.f32.mrf.mxu0 }
  0xac   :  { %v487_v17 = vpop.f32.mrf.mxu1 }
  0xad   :  { %v488_v26 = vadd.f32 %v487_v17, %v473_v16 }
  0xb3   :  { %v501_v18 = vpop.f32.mrf.mxu2  ;;  %v475_v20 = vpop.f32.mrf.mxu0 }
  0xb4   :  { %v515_v19 = vpop.f32.mrf.mxu3  ;;  %v489_v21 = vpop.f32.mrf.mxu1  ;;  %v502_v28 = vadd.f32 %v501_v18, %v488_v26 }
  0xb5   :  { %v490_v55 = vadd.f32 %v489_v21, %v475_v20 }
  0xb6   :  { %v516_v30 = vadd.f32 %v515_v19, %v502_v28 }
  0xbb   :  { %v503_v22 = vpop.f32.mrf.mxu2 }
  0xbc   :  { %v517_v23 = vpop.f32.mrf.mxu3  ;;  %v504_v34 = vadd.f32 %v503_v22, %v490_v55 }
  0xbe   :  { %v518_v39 = vadd.f32 %v517_v23, %v504_v34 }
  0xcb   :  { %v529_v24 = vpop.f32.mrf.mxu0 }
  0xcc   :  { %v543_v25 = vpop.f32.mrf.mxu1 }
  0xcd   :  { %v544_v27 = vadd.f32 %v543_v25, %v529_v24 }
  0xd3   :  { %v557_v62 = vpop.f32.mrf.mxu2  ;;  %v531_v61 = vpop.f32.mrf.mxu0 }
  0xd4   :  { %v558_v29 = vadd.f32 %v557_v62, %v544_v27  ;;  %v571_v0 = vpop.f32.mrf.mxu3  ;;  %v545_v32 = vpop.f32.mrf.mxu1 }
  0xd5   :  { %v546_v35 = vadd.f32 %v545_v32, %v531_v61 }
  0xd6   :  { %v572_v31 = vadd.f32 %v571_v0, %v558_v29 }
  0xd8   :  { %v591_v33 = vpack.c.bf16 %v572_v31, %v516_v30 }
  0xda   :  { %593 = vst [vmem:[#allocation8] sm:$0xff] %v591_v33 }
  0xdb   :  { %v559_v36 = vpop.f32.mrf.mxu2 }
  0xdc   :  { %v560_v37 = vadd.f32 %v559_v36, %v546_v35  ;;  %v573_v38 = vpop.f32.mrf.mxu3 }
  0xde   :  { %v574_v40 = vadd.f32 %v573_v38, %v560_v37 }
  0xe0   :  { %v592_v41 = vpack.c.bf16 %v574_v40, %v518_v39 }
  0xe2   :  { %594 = vst [vmem:[#allocation8 + $0x8] sm:$0xff] %v592_v41 }
  0xe3   :  { %607 = dma.vmem_to_hbm [thread:$0]  %s600_s1, 256, %s602_s25, [#allocation5], %s1044_s21, %s1044_s21, %s1045_s22  }
  0xe4   :  { %1038 = dma.done.wait [#allocation5], 256  }
  0xe5   :  { %1039 = vsyncadd [#allocation5], 4294967040 }
  0xe6   :  { %612 = vsyncpa [#allocation4], 1 }
  0xe7   :  { %613 = vsyncpa [#allocation7], 1 }
  0xe8   :  { %614 = vsyncpa [#allocation5], 1 }

</bundles_post_ra>
